<compile_context>
chip_gen: v5e
topology: v5e:2x2
jax: 0.10.0
libtpu: 0.0.40
codegen_flags: <defaults>
</compile_context>

<pallas_src>
import math
import functools

import jax
import jax.numpy as jnp
from jax.experimental import pallas as pl
from jax.experimental.pallas import tpu as pltpu


_LANE = 128


# ---------------------------------------------------------------------------
# Kernel bodies
# ---------------------------------------------------------------------------

def _linear_bias_single_k_kernel(x_ref, w_ref, b_ref, o_ref):
    """Whole K resident in VMEM: one MXU matmul + bias add per output tile."""
    acc = jnp.dot(x_ref[...], w_ref[...], preferred_element_type=jnp.float32)
    o_ref[...] = (acc + b_ref[...].astype(jnp.float32)).astype(o_ref.dtype)


def _mask_k_operands(x, w, k, k_dim, tk):
    """Zero the trailing (out-of-range) K slice of both operands on the last K
    block, so garbage in the partial edge block cannot pollute the result."""
    valid = k_dim - k * tk
    col = jax.lax.broadcasted_iota(jnp.int32, x.shape, 1)
    row = jax.lax.broadcasted_iota(jnp.int32, w.shape, 0)
    x = jnp.where(col < valid, x, jnp.zeros_like(x))
    w = jnp.where(row < valid, w, jnp.zeros_like(w))
    return x, w


def _linear_bias_multik_f32_kernel(x_ref, w_ref, b_ref, o_ref, *, k_dim, tk, mask_k):
    """K is the last ('arbitrary') grid axis; the f32 output tile is resident
    across K (its index_map ignores k), so accumulate directly into it.
    The bias seeds the accumulator on the first K step."""
    k = pl.program_id(2)
    x = x_ref[...]
    w = w_ref[...]
    if mask_k:
        x, w = _mask_k_operands(x, w, k, k_dim, tk)
    acc = jnp.dot(x, w, preferred_element_type=jnp.float32)

    @pl.when(k == 0)
    def _():
        o_ref[...] = acc + b_ref[...].astype(jnp.float32)

    @pl.when(k != 0)
    def _():
        o_ref[...] += acc


def _linear_bias_multik_acc_kernel(x_ref, w_ref, b_ref, o_ref, acc_ref,
                                   *, k_dim, tk, mask_k):
    """Generic path (non-f32 output): f32 VMEM accumulator, cast on last K step."""
    k = pl.program_id(2)

    @pl.when(k == 0)
    def _():
        acc_ref[...] = jnp.broadcast_to(
            b_ref[...].astype(jnp.float32), acc_ref.shape)

    x = x_ref[...]
    w = w_ref[...]
    if mask_k:
        x, w = _mask_k_operands(x, w, k, k_dim, tk)
    acc_ref[...] += jnp.dot(x, w, preferred_element_type=jnp.float32)

    @pl.when(k == pl.num_programs(2) - 1)
    def _():
        o_ref[...] = acc_ref[...].astype(o_ref.dtype)


# ---------------------------------------------------------------------------
# Hardware detection / tile selection
# ---------------------------------------------------------------------------

def _round_up(v, m):
    return ((v + m - 1) // m) * m


def _sublane(dtype):
    return {4: 8, 2: 16, 1: 32}.get(jnp.dtype(dtype).itemsize, 8)


@functools.lru_cache(maxsize=1)
def _tpu_hw():
    """Returns (n_parallel_cores, physical_vmem_bytes, is_v7). Conservative fallbacks."""
    kind = ""
    try:
        kind = jax.devices()[0].device_kind.lower()
    except Exception:
        pass
    is_v7 = "v7" in kind
    multi_core = is_v7 or ("v3" in kind) or ("v4" in kind) or ("v5p" in kind)

    vmem = None
    try:
        vmem = int(getattr(pltpu.get_tpu_info(), "vmem_capacity_bytes"))
    except Exception:
        vmem = None
    if not vmem or vmem <= 0:
        if is_v7 or not kind:
            vmem = 64 * 1024 * 1024       # conservative (v7x / unknown)
        else:
            vmem = 128 * 1024 * 1024      # v4/v5e/v5p/v6e
    return (2 if multi_core else 1), vmem, is_v7


def _choose_tiles(M, K, N, in_item, out_item, budget, sublane):
    """Pick (tm, tn, tk) minimizing estimated HBM traffic subject to the VMEM
    budget; prefers gm == 1 (weight read once) / gk == 1 (no K reduction loop)
    and otherwise balances gn*M*K against gm*K*N. Grows tiles to fill VMEM."""
    Mp = _round_up(M, sublane)
    Kp = _round_up(K, _LANE)
    Np = _round_up(N, _LANE)

    def ladder(full, quants):
        cands = {full}
        for q in quants:
            if q < full:
                cands.add(q)
        return sorted(cands)

    tm_c = ladder(Mp, (sublane, 128, 256, 512, 1024, 2048))
    tn_c = ladder(Np, (128, 256, 512, 1024, 2048, 4096))
    tk_c = ladder(Kp, (256, 512, 1024, 2048, 4096))

    best = None
    for tm in tm_c:
        for tn in tn_c:
            for tk in tk_c:
                gm = -(-Mp // tm)
                gn = -(-Np // tn)
                gk = -(-Kp // tk)
                # double-buffered x/w/bias/out (+ f32 accumulator if K tiled)
                need = (2 * (tm * tk + tk * tn + tn) * in_item
                        + 2 * tm * tn * out_item
                        + (tm * tn * 4 if gk > 1 else 0))
                if need > budget:
                    continue
                traffic = (gn * M * K * in_item     # x re-read per N tile
                           + gm * K * N * in_item   # weight re-read per M tile
                           + M * N * out_item)
                steps = gm * gn * gk
                key = (traffic, steps, -(tm * tn * tk))
                if best is None or key < best[0]:
                    best = (key, (tm, tn, tk))
    if best is None:
        # Even the smallest candidate exceeds the budget (shouldn't happen for
        # any sane budget); fall back to a small legal tile.
        return min(Mp, sublane * 16), min(Np, 512), min(Kp, 512)
    return best[1]


# ---------------------------------------------------------------------------
# Wrapper
# ---------------------------------------------------------------------------

@functools.partial(jax.jit, static_argnames=("tm", "tn", "tk"))
def linear_layer_jacobian_forward(x, weight, bias, *, tm=None, tn=None, tk=None):
    """Pallas equivalent of LinearLayerJacobian.forward: returns (x @ W + b, x)."""
    M, K = x.shape
    K2, N = weight.shape
    assert K == K2, (x.shape, weight.shape)
    assert bias.shape == (1, N), bias.shape

    out_dtype = jnp.result_type(x.dtype, weight.dtype, bias.dtype)
    in_item = max(jnp.dtype(x.dtype).itemsize, jnp.dtype(weight.dtype).itemsize)
    out_item = jnp.dtype(out_dtype).itemsize
    sublane = _sublane(x.dtype)

    n_cores, phys_vmem, is_v7 = _tpu_hw()
    budget = int(phys_vmem * 0.45)
    vmem_limit = int(max(32 * 1024 * 1024,
                         min(phys_vmem * 3 // 4, phys_vmem - 16 * 1024 * 1024)))

    # --- tile selection (auto unless explicitly overridden) -----------------
    if tm is None or tn is None or tk is None:
        a_tm, a_tn, a_tk = _choose_tiles(M, K, N, in_item, out_item, budget, sublane)
        tm = tm if tm is not None else a_tm
        tn = tn if tn is not None else a_tn
        tk = tk if tk is not None else a_tk
    tm = _round_up(min(tm, _round_up(M, sublane)), sublane)
    tn = _round_up(min(tn, _round_up(N, _LANE)), _LANE)
    tk = _round_up(min(tk, _round_up(K, _LANE)), _LANE)

    gm = -(-M // tm)
    gn = -(-N // tn)
    gk = -(-K // tk)

    # Multi-TensorCore chips (v7x / megacore): make sure the parallel portion of
    # the grid has at least 2 steps so no core sits idle.
    if n_cores >= 2 and gm * gn < 2:
        if N > _LANE:
            tn = _round_up(-(-_round_up(N, _LANE) // 2), _LANE)
            gn = -(-N // tn)
        elif M > sublane:
            tm = _round_up(-(-_round_up(M, sublane) // 2), sublane)
            gm = -(-M // tm)

    # Block shapes: use the exact full dim when an axis is not tiled (avoids any
    # padding), otherwise the (sublane/lane)-aligned tile with a partial edge
    # block handled by Pallas (OOB output writes are dropped).
    bm = M if gm == 1 else tm
    bn = N if gn == 1 else tn
    bk = K if gk == 1 else tk

    x_reads = 1 if gk == 1 else gn
    cost = pl.CostEstimate(
        flops=2 * M * K * N,
        transcendentals=0,
        bytes_accessed=int(x_reads * M * K * in_item
                           + gm * K * N * in_item
                           + gm * gn * N * in_item          # bias (negligible)
                           + M * N * out_item),
    )

    is_f32_out = jnp.dtype(out_dtype) == jnp.dtype("float32")

    if gk == 1:
        out = pl.pallas_call(
            _linear_bias_single_k_kernel,
            out_shape=jax.ShapeDtypeStruct((M, N), out_dtype),
            grid_spec=pltpu.PrefetchScalarGridSpec(
                num_scalar_prefetch=0,
                grid=(gm, gn),
                in_specs=[
                    pl.BlockSpec((bm, K), lambda i, j: (i, 0)),   # x
                    pl.BlockSpec((K, bn), lambda i, j: (0, j)),   # weight
                    pl.BlockSpec((1, bn), lambda i, j: (0, j)),   # bias
                ],
                out_specs=pl.BlockSpec((bm, bn), lambda i, j: (i, j)),
            ),
            compiler_params=pltpu.CompilerParams(
                dimension_semantics=("parallel", "parallel"),
                vmem_limit_bytes=vmem_limit,
            ),
            cost_estimate=cost,
        )(x, weight, bias)
    else:
        mask_k = (K % tk) != 0
        kern_kwargs = dict(k_dim=K, tk=tk, mask_k=mask_k)

        # On v7x the per-step weight-tile DMA can exceed the MXU time; triple
        # buffering hides DMA jitter when there is VMEM headroom.
        stream_kwargs = {}
        if is_v7:
            need3 = (3 * (bm * tk + tk * bn) * in_item
                     + 2 * bn * in_item
                     + 2 * bm * bn * out_item
                     + (0 if is_f32_out else bm * bn * 4))
            if need3 <= budget:
                stream_kwargs = dict(pipeline_mode=pl.Buffered(3))

        in_specs = [
            pl.BlockSpec((bm, tk), lambda i, j, k: (i, k), **stream_kwargs),
            pl.BlockSpec((tk, bn), lambda i, j, k: (k, j), **stream_kwargs),
            pl.BlockSpec((1, bn), lambda i, j, k: (0, j)),
        ]
        out_spec = pl.BlockSpec((bm, bn), lambda i, j, k: (i, j))
        cp = pltpu.CompilerParams(
            dimension_semantics=("parallel", "parallel", "arbitrary"),
            vmem_limit_bytes=vmem_limit,
        )

        if is_f32_out:
            kern = functools.partial(_linear_bias_multik_f32_kernel, **kern_kwargs)
            scratch = []
        else:
            kern = functools.partial(_linear_bias_multik_acc_kernel, **kern_kwargs)
            scratch = [pltpu.VMEM((bm, bn), jnp.float32)]

        out = pl.pallas_call(
            kern,
            out_shape=jax.ShapeDtypeStruct((M, N), out_dtype),
            grid_spec=pltpu.PrefetchScalarGridSpec(
                num_scalar_prefetch=0,
                grid=(gm, gn, gk),
                in_specs=in_specs,
                out_specs=out_spec,
                scratch_shapes=scratch,
            ),
            compiler_params=cp,
            cost_estimate=cost,
        )(x, weight, bias)

    # forward() also returns the input x (the layer's cache) unchanged.
    return out, x


# ---------------------------------------------------------------------------
# Parameter init (matches reset_parameters() of the PyTorch module)
# ---------------------------------------------------------------------------

def init_params(key, in_features, out_features, dtype=jnp.float32):
    """kaiming_uniform_(weight, a=sqrt(5)) + uniform bias in [-1/sqrt(fan_in), 1/sqrt(fan_in)].
    NOTE: torch computes fan_in on the (in, out)-shaped weight, so fan_in = out_features
    for both bounds (reproducing the reference module's behavior exactly)."""
    kw, kb = jax.random.split(key)
    fan_in = out_features
    gain = math.sqrt(2.0 / (1.0 + 5.0))  # leaky_relu gain with a = sqrt(5)
    w_bound = gain * math.sqrt(3.0 / fan_in)
    weight = jax.random.uniform(
        kw, (in_features, out_features), dtype=dtype, minval=-w_bound, maxval=w_bound)
    b_bound = 1.0 / math.sqrt(fan_in) if fan_in > 0 else 0.0
    bias = jax.random.uniform(
        kb, (1, out_features), dtype=dtype, minval=-b_bound, maxval=b_bound)
    return weight, bias


if __name__ == "__main__":
    key = jax.random.PRNGKey(0)
    k_x, k_p = jax.random.split(key)

    # Small, deliberately non-tile-aligned shapes (no padding is performed).
    batch, in_features, out_features = 8, 200, 136
    dtype = jnp.float32

    x = jax.random.normal(k_x, (batch, in_features), dtype=dtype)
    weight, bias = init_params(k_p, in_features, out_features, dtype=dtype)
    ref = x @ weight + bias

    # 1) Auto-tiled path: K collapses to a single block, weight read once.
    out, cache_x = linear_layer_jacobian_forward(x, weight, bias)
    out = jax.block_until_ready(out)
    cache_x = jax.block_until_ready(cache_x)
    assert out.shape == (batch, out_features)
    assert cache_x.shape == x.shape
    assert jnp.allclose(out, ref, atol=1e-5, rtol=1e-5)
    assert jnp.array_equal(cache_x, x)

    # 2) Forced tiny tiles: exercises the multi-step K reduction kernel with
    #    K-remainder masking and partial (non-divisible) N edge blocks.
    out2, _ = linear_layer_jacobian_forward(x, weight, bias, tm=8, tn=128, tk=128)
    out2 = jax.block_until_ready(out2)
    assert jnp.allclose(out2, ref, atol=1e-5, rtol=1e-5)

    print("KERNEL_OK")
</pallas_src>

<mosaic_0001>
module attributes {stable_mosaic.version = 11 : i64} {
  func.func @_linear_bias_single_k_kernel(%arg0: i32, %arg1: i32, %arg2: memref<8x200xf32, #tpu.memory_space<vmem>>, %arg3: memref<200x136xf32, #tpu.memory_space<vmem>>, %arg4: memref<1x136xf32, #tpu.memory_space<vmem>>, %arg5: memref<8x136xf32, #tpu.memory_space<vmem>>) attributes {dimension_semantics = [#tpu.dimension_semantics<parallel>, #tpu.dimension_semantics<parallel>], iteration_bounds = array<i64: 1, 1>, scalar_prefetch = 0 : i64, scratch_operands = 0 : i64, tpu.core_type = #tpu.core_type<tc>, window_params = [{transform_indices = @transform_0, window_bounds = array<i64: 8, 200>}, {transform_indices = @transform_1, window_bounds = array<i64: 200, 136>}, {transform_indices = @transform_2, window_bounds = array<i64: 1, 136>}, {transform_indices = @transform_3, window_bounds = array<i64: 8, 136>}]} {
    %c0 = arith.constant 0 : index
    %c0_0 = arith.constant 0 : index
    %0 = vector.load %arg2[%c0, %c0_0] : memref<8x200xf32, #tpu.memory_space<vmem>>, vector<8x200xf32>
    %c0_1 = arith.constant 0 : index
    %c0_2 = arith.constant 0 : index
    %1 = vector.load %arg3[%c0_1, %c0_2] : memref<200x136xf32, #tpu.memory_space<vmem>>, vector<200x136xf32>
    %cst = arith.constant dense<0.000000e+00> : vector<8x136xf32>
    %2 = tpu.matmul %0, %1, %cst {dimension_numbers = #tpu.dot_dimension_numbers<[1], [0], [0], [1], [0, 0, 1, 1], [], []>} : vector<8x200xf32>, vector<200x136xf32>, vector<8x136xf32> -> vector<8x136xf32>
    %c0_3 = arith.constant 0 : index
    %c0_4 = arith.constant 0 : index
    %3 = vector.load %arg4[%c0_3, %c0_4] : memref<1x136xf32, #tpu.memory_space<vmem>>, vector<1x136xf32>
    %4 = vector.broadcast %3 : vector<1x136xf32> to vector<8x136xf32>
    %5 = arith.addf %2, %4 : vector<8x136xf32>
    %c0_5 = arith.constant 0 : index
    %c0_6 = arith.constant 0 : index
    %6 = vector.load %arg5[%c0_5, %c0_6] : memref<8x136xf32, #tpu.memory_space<vmem>>, vector<8x136xf32>
    tpu.vector_store %arg5[%c0_5, %c0_6], %5 {strides = array<i32>} : memref<8x136xf32, #tpu.memory_space<vmem>>, vector<8x136xf32>,
    return
  }
  func.func @transform_0(%arg0: i32, %arg1: i32) -> (i32, i32) {
    %c0_i32 = arith.constant 0 : i32
    %c0_i32_0 = arith.constant 0 : i32
    return %arg0, %c0_i32 : i32, i32
  }
  func.func @transform_1(%arg0: i32, %arg1: i32) -> (i32, i32) {
    %c0_i32 = arith.constant 0 : i32
    %c0_i32_0 = arith.constant 0 : i32
    return %c0_i32, %arg1 : i32, i32
  }
  func.func @transform_2(%arg0: i32, %arg1: i32) -> (i32, i32) {
    %c0_i32 = arith.constant 0 : i32
    %c0_i32_0 = arith.constant 0 : i32
    return %c0_i32, %arg1 : i32, i32
  }
  func.func @transform_3(%arg0: i32, %arg1: i32) -> (i32, i32) {
    %c0_i32 = arith.constant 0 : i32
    return %arg0, %arg1 : i32, i32
  }
}

</mosaic_0001>

<bundles_post_ra>
// kernel: linear_layer_jacobian_forward.1
= control target key start
LH: loop header
LB: loop body
LE: loop exit
PB: predicated region body
PF: predicated region fallthrough
CT: control target
= control target key end

     0   :  { %s390_s0 = inlined_call_operand.vmem [shape: f32[8,200], index: 0, kind: input, shape index: {}]   ;;  %s391_s1 = inlined_call_operand.vmem [shape: f32[200,136], index: 1, kind: input, shape index: {}]   ;;  %s392_s2 = inlined_call_operand.vmem [shape: f32[1,136], index: 2, kind: input, shape index: {}]   ;;  %s393_s3 = inlined_call_operand.hbm [shape: f32[8,136], index: 3, kind: output, shape index: {}]  }
   0x1   :  { %v48_v0 = vld [vmem:[%s391_s1 + $0xf8] sm:$0xff]  ;;  %v46_v1 = vld [vmem:[%s391_s1 + $0xe8] sm:$0xff]  ;;  %v47_v2 = vld [vmem:[%s391_s1 + $0xf0] sm:$0xff] }
   0x2   :  { %117 = vmatpush.msra.mxu2 %v48_v0  ;;  %v45_v3 = vld [vmem:[%s391_s1 + $0xe0] sm:$0xff]  ;;  %v44_v4 = vld [vmem:[%s391_s1 + $0xd8] sm:$0xff]  ;;  %77 = vmatpush.msra.mxu0 %v47_v2  ;;  %v43_v5 = vld [vmem:[%s391_s1 + $0xd0] sm:$0xff] }
   0x3   :  { %v42_v6 = vld [vmem:[%s391_s1 + $0xc8] sm:$0xff]  ;;  %v41_v7 = vld [vmem:[%s391_s1 + $0xc0] sm:$0xff]  ;;  %v40_v9 = vld [vmem:[%s391_s1 + $0xb8] sm:$0xff] }
   0x4   :  { %118 = vmatpush.msra.mxu2 %v46_v1  ;;  %78 = vmatpush.msra.mxu0 %v45_v3  ;;  %v66_v8 = vld [vmem:[%s391_s1 + $0x188] sm:$0xff]  ;;  %v64_v10 = vld [vmem:[%s391_s1 + $0x178] sm:$0xff]  ;;  %v39_v11 = vld [vmem:[%s391_s1 + $0xb0] sm:$0xff] }
   0x5   :  { %144 = vmatpush.msra.mxu3 %v66_v8  ;;  %v62_v12 = vld [vmem:[%s391_s1 + $0x168] sm:$0xff]  ;;  %v65_v13 = vld [vmem:[%s391_s1 + $0x180] sm:$0xff]  ;;  %v60_v16 = vld [vmem:[%s391_s1 + $0x158] sm:$0xff] }
   0x6   :  { %119 = vmatpush.msra.mxu2 %v44_v4  ;;  %79 = vmatpush.msra.mxu0 %v43_v5  ;;  %v38_v14 = vld [vmem:[%s391_s1 + $0xa8] sm:$0xff]  ;;  %v37_v15 = vld [vmem:[%s391_s1 + $0xa0] sm:$0xff]  ;;  %v63_v17 = vld [vmem:[%s391_s1 + $0x170] sm:$0xff] }
   0x7   :  { %145 = vmatpush.msra.mxu3 %v64_v10  ;;  %104 = vmatpush.msra.mxu1 %v65_v13  ;;  %v36_v18 = vld [vmem:[%s391_s1 + $0x98] sm:$0xff]  ;;  %v61_v19 = vld [vmem:[%s391_s1 + $0x160] sm:$0xff]  ;;  %v35_v20 = vld [vmem:[%s391_s1 + $0x90] sm:$0xff] }
   0x8   :  { %120 = vmatpush.msra.mxu2 %v42_v6  ;;  %80 = vmatpush.msra.mxu0 %v41_v7  ;;  %v58_v21 = vld [vmem:[%s391_s1 + $0x148] sm:$0xff]  ;;  %v59_v23 = vld [vmem:[%s391_s1 + $0x150] sm:$0xff]  ;;  %v33_v24 = vld [vmem:[%s391_s1 + $0x80] sm:$0xff] }
   0x9   :  { %146 = vmatpush.msra.mxu3 %v62_v12  ;;  %105 = vmatpush.msra.mxu1 %v63_v17  ;;  %v34_v22 = vld [vmem:[%s391_s1 + $0x88] sm:$0xff]  ;;  %v56_v25 = vld [vmem:[%s391_s1 + $0x138] sm:$0xff]  ;;  %v57_v27 = vld [vmem:[%s391_s1 + $0x140] sm:$0xff] }
   0xa   :  { %121 = vmatpush.msra.mxu2 %v40_v9  ;;  %81 = vmatpush.msra.mxu0 %v39_v11  ;;  %v32_v26 = vld [vmem:[%s391_s1 + $0x78] sm:$0xff]  ;;  %v31_v28 = vld [vmem:[%s391_s1 + $0x70] sm:$0xff]  ;;  %v54_v29 = vld [vmem:[%s391_s1 + $0x128] sm:$0xff] }
   0xb   :  { %147 = vmatpush.msra.mxu3 %v60_v16  ;;  %106 = vmatpush.msra.mxu1 %v61_v19  ;;  %v30_v30 = vld [vmem:[%s391_s1 + $0x68] sm:$0xff]  ;;  %v55_v31 = vld [vmem:[%s391_s1 + $0x130] sm:$0xff]  ;;  %v29_v32 = vld [vmem:[%s391_s1 + $0x60] sm:$0xff] }
   0xc   :  { %122 = vmatpush.msra.mxu2 %v38_v14  ;;  %82 = vmatpush.msra.mxu0 %v37_v15  ;;  %v52_v33 = vld [vmem:[%s391_s1 + $0x118] sm:$0xff] }
   0xd   :  { %148 = vmatpush.msra.mxu3 %v58_v21  ;;  %107 = vmatpush.msra.mxu1 %v59_v23 }
   0xe   :  { %123 = vmatpush.msra.mxu2 %v36_v18  ;;  %83 = vmatpush.msra.mxu0 %v35_v20 }
   0xf   :  { %149 = vmatpush.msra.mxu3 %v56_v25  ;;  %108 = vmatpush.msra.mxu1 %v57_v27 }
  0x10   :  { %124 = vmatpush.msra.mxu2 %v34_v22  ;;  %84 = vmatpush.msra.mxu0 %v33_v24 }
  0x12   :  { %125 = vmatpush.msra.mxu2 %v32_v26 }
  0x13   :  { %8 = vsyncpa [#allocation3], 0  ;;  %v28_v34 = vld [vmem:[%s391_s1 + $0x58] sm:$0xff]  ;;  %85 = vmatpush.msra.mxu0 %v31_v28  ;;  %150 = vmatpush.msra.mxu3 %v54_v29  ;;  %v53_v35 = vld [vmem:[%s391_s1 + $0x120] sm:$0xff]  ;;  %vm73_vm0 = vcmask 588800   ;;  %s167_s12 = sshll.u32 %s393_s3, 4  ;;  %s168_s12 = int_to_ptr.hbm [resolvable:$true] %s167_s12 }
  0x14   :  { %126 = vmatpush.msra.mxu2 %v30_v30  ;;  %v27_v36 = vld [vmem:[%s391_s1 + $0x50] sm:$0xff]  ;;  %109 = vmatpush.msra.mxu1 %v55_v31  ;;  %v50_v37 = vld [vmem:[%s391_s1 + $0x108] sm:$0xff]  ;;  %v25_v40 = vld [vmem:[%s391_s1 + $0x40] sm:$0xff]  ;;  %vm158_vm1 = vcmask 64512  }
  0x15   :  { %v26_v38 = vld [vmem:[%s391_s1 + $0x48] sm:$0xff]  ;;  %86 = vmatpush.msra.mxu0 %v29_v32  ;;  %151 = vmatpush.msra.mxu3 %v52_v33  ;;  %v51_v41 = vld [vmem:[%s391_s1 + $0x110] sm:$0xff]  ;;  %v24_v42 = vld [vmem:[%s391_s1 + $0x38] sm:$0xff] }
  0x16   :  { %v16_v39 = vld [vmem:[%s390_s0 + $0x8] sm:$0xff]  ;;  %127 = vmatpush.msra.mxu2 %v28_v34  ;;  %110 = vmatpush.msra.mxu1 %v53_v35  ;;  %v23_v43 = vld [vmem:[%s391_s1 + $0x30] sm:$0xff]  ;;  %v49_v44 = vld [vmem:[%s391_s1 + $0x100] sm:$0xff] }
  0x17   :  { %87 = vmatpush.msra.mxu0 %v27_v36  ;;  %152 = vmatpush.msra.mxu3 %v50_v37  ;;  %v22_v45 = vld [vmem:[%s391_s1 + $0x28] sm:$0xff]  ;;  %v21_v46 = vld [vmem:[%s391_s1 + $0x20] sm:$0xff]  ;;  %v20_v47 = vld [vmem:[%s391_s1 + $0x18] sm:$0xff] }
  0x18   :  { %128 = vmatpush.msra.mxu2 %v26_v38  ;;  %177 = vmatmul.msk.f32.vlgmr.msra.gmra.mxu3 %vm73_vm0, %v16_v39  ;;  %v19_v48 = vld [vmem:[%s391_s1 + $0x10] sm:$0xff]  ;;  %v18_v49 = vld [vmem:[%s391_s1 + $0x8] sm:$0xff]  ;;  %v15_v50 = vld [vmem:[%s390_s0] sm:$0xff]  ;;  %s205_s0 = smov [#allocation2]  }
  0x19   :  { %88 = vmatpush.msra.mxu0 %v25_v40  ;;  %111 = vmatpush.msra.mxu1 %v51_v41  ;;  %v17_v51 = vld [vmem:[%s391_s1] sm:$0xff]  ;;  %s165_s1 = sshll.u32 %s205_s0, 4  ;;  %s166_s1 = int_to_ptr.vmem [resolvable:$true] %s165_s1 }
  0x1a   :  { %129 = vmatpush.msra.mxu2 %v24_v42  ;;  %v67_v52 = vld [vmem:[%s392_s2] sm:$0x3] }
  0x1b   :  { %89 = vmatpush.msra.mxu0 %v23_v43  ;;  %112 = vmatpush.msra.mxu1 %v49_v44  ;;  %v69_v53 = vperm.slane %v67_v52, 0  ;;  %v70_v57 = vperm.slane %v67_v52, 1 }
  0x1c   :  { %130 = vmatpush.msra.mxu2 %v22_v45  ;;  %176 = vmatmul.msk.f32.vlgmr.msra.gmra.mxu1 %vm73_vm0, %v16_v39 }
  0x1d   :  { %90 = vmatpush.msra.mxu0 %v21_v46 }
  0x1e   :  { %131 = vmatpush.msra.mxu2 %v20_v47 }
  0x1f   :  { %91 = vmatpush.msra.mxu0 %v19_v48 }
  0x20   :  { %132 = vmatpush.msra.mxu2 %v18_v49 }
  0x21   :  { %133 = vmatmul.f32.vlgmr.msra.gmra.mxu2 %v15_v50  ;;  %92 = vmatpush.msra.mxu0 %v17_v51 }
  0x22   :  { %93 = vmatmul.f32.vlgmr.msra.gmra.mxu0 %v15_v50 }
  0x99   :  { %v114_v55 = vpop.f32.mrf.mxu1 }
  0x9b   :  { %v154_v60 = vpop.f32.mrf.mxu3 }
  0x9f   :  { %v94_v54 = vpop.f32.mrf.mxu0 }
  0xa0   :  { %v95_v56 = vadd.f32 %v94_v54, %v69_v53 }
  0xa2   :  { %v115_v58 = vadd.f32 %v114_v55, %v95_v56 }
  0xa4   :  { %v134_v59 = vpop.f32.mrf.mxu2  ;;  %157 = vst [vmem:[#allocation2] sm:$0xff] %v115_v58 }
  0xa5   :  { %v135_v61 = vadd.f32 %v134_v59, %v70_v57 }
  0xa7   :  { %v155_v62 = vadd.f32 %v154_v60, %v135_v61 }
  0xa9   :  { %159 = vst.msk [vmem:[#allocation2 + $0x8] sm:$0xff] %vm158_vm1, %v155_v62 }
  0xaa   :  { %170 = dma.vmem_to_hbm [thread:$0]  %s166_s1, 256, %s168_s12, [#allocation3]  }
  0xab   :  { %203 = dma.done.wait [#allocation3], 256  }
  0xac   :  { %204 = vsyncadd [#allocation3], 4294967040 }
  0xad   :  { %175 = vsyncpa [#allocation3], 1 }

</bundles_post_ra>
